<compile_context>
chip_gen: v6e
topology: v6e:2x2x1
jax: 0.10.0
libtpu: 0.0.40
codegen_flags: <defaults>
</compile_context>

<pallas_src>
import functools

import jax
import jax.numpy as jnp
from jax.experimental import pallas as pl
from jax.experimental.pallas import tpu as pltpu


def _cdiv(a, b):
    return (a + b - 1) // b


def _round_up(x, m):
    return (x + m - 1) // m * m


_ALIGN = 16  # row alignment of slab regions (safe for f32 (8,128) and bf16 (16,128) tiling)


def _slab_layout(input_dim, latent_dim, gear_length, hidden):
    """Row/col layout of the packed weight slab (weights only, biases are separate f32)."""
    r_wg1 = 0
    r_wphys = r_wg1 + _round_up(gear_length, _ALIGN)
    r_wg2e = r_wphys + _round_up(input_dim, _ALIGN)
    r_we2 = r_wg2e + _round_up(latent_dim, _ALIGN)
    rows = r_we2 + _round_up(hidden, _ALIGN)
    cols = max(hidden, latent_dim)
    return dict(hidden=hidden, r_wg1=r_wg1, r_wphys=r_wphys, r_wg2e=r_wg2e,
                r_we2=r_we2, rows=rows, cols=cols)


def pack_params(raw, input_dim, latent_dim, gear_length, gear_dim,
                weight_dtype=jnp.float32):
    """Fold + pack PhysicsEncoder parameters.

    Raw weights are stored (in_features, out_features) (transpose of nn.Linear.weight),
    biases are 1-D (out_features,).  Returns (weight_slab, bias_f32, layout).
    """
    hidden = raw["we2"].shape[0]  # 64
    assert raw["we1"].shape[0] == input_dim + gear_dim
    lay = _slab_layout(input_dim, latent_dim, gear_length, hidden)

    we1p = raw["we1"][:input_dim, :]        # (input_dim, hidden)
    we1g = raw["we1"][input_dim:, :]        # (gear_dim, hidden)
    wg2e = raw["wg2"] @ we1g                # (latent_dim, hidden) -- offline fold (f32)
    bcat = raw["bg2"] @ we1g + raw["be1"]   # (hidden,)

    slab = jnp.zeros((lay["rows"], lay["cols"]), jnp.float32)
    slab = slab.at[lay["r_wg1"]:lay["r_wg1"] + gear_length, :latent_dim].set(raw["wg1"])
    slab = slab.at[lay["r_wphys"]:lay["r_wphys"] + input_dim, :hidden].set(we1p)
    slab = slab.at[lay["r_wg2e"]:lay["r_wg2e"] + latent_dim, :hidden].set(wg2e)
    slab = slab.at[lay["r_we2"]:lay["r_we2"] + hidden, :latent_dim].set(raw["we2"])

    bias = jnp.zeros((3, lay["cols"]), jnp.float32)   # biases always f32
    bias = bias.at[0, :latent_dim].set(raw["bg1"])
    bias = bias.at[1, :hidden].set(bcat)
    bias = bias.at[2, :latent_dim].set(raw["be2"])

    return slab.astype(weight_dtype), bias, lay


def _physics_encoder_kernel(phys_ref, gear_ref, slab_ref, bias_ref, out_ref, *, lay):
    f32 = jnp.float32
    cdt = slab_ref.dtype                 # dot-input dtype (f32 or bf16); accum stays f32
    input_dim = phys_ref.shape[-1]
    gear_length = gear_ref.shape[-1]
    latent_dim = out_ref.shape[-1]
    hidden = lay["hidden"]

    # Static slices of the VMEM-resident weight slab / f32 bias block.
    wg1 = slab_ref[lay["r_wg1"]:lay["r_wg1"] + gear_length, :latent_dim]
    wphys = slab_ref[lay["r_wphys"]:lay["r_wphys"] + input_dim, :hidden]
    wg2e = slab_ref[lay["r_wg2e"]:lay["r_wg2e"] + latent_dim, :hidden]
    we2 = slab_ref[lay["r_we2"]:lay["r_we2"] + hidden, :latent_dim]
    bg1 = bias_ref[0:1, :latent_dim]
    bcat = bias_ref[1:2, :hidden]
    be2 = bias_ref[2:3, :latent_dim]

    # ---- gear encoder: Linear -> (Dropout = id) -> ReLU ----
    h = jnp.dot(gear_ref[...].astype(cdt), wg1, preferred_element_type=f32) + bg1
    h = jnp.maximum(h, 0.0)

    # ---- folded cat([phys, gear_latent]) @ We1 + be1: two independent MXU pushes ----
    z = (jnp.dot(phys_ref[...].astype(cdt), wphys, preferred_element_type=f32)
         + jnp.dot(h.astype(cdt), wg2e, preferred_element_type=f32)
         + bcat)
    z = jnp.maximum(z, 0.0)

    # ---- final Linear, exact latent_dim-wide store ----
    out_ref[...] = (jnp.dot(z.astype(cdt), we2, preferred_element_type=f32)
                    + be2).astype(out_ref.dtype)


def physics_encoder(physics_params, gear_params, slab, bias, lay, latent_dim,
                    *, block_b_max=2048):
    """Pallas implementation of PhysicsEncoder.forward (dropout = identity).

    physics_params: (B, input_dim) or (input_dim,)
    gear_params:    (B, gear_length) or (gear_length,)
    slab, bias, lay: from pack_params()
    returns:        (B, latent_dim) float32
    """
    # Mirror torch's unsqueeze(0) for 1-D inputs.
    if physics_params.ndim == 1:
        physics_params = physics_params[None, :]
    if gear_params.ndim == 1:
        gear_params = gear_params[None, :]

    physics_params = physics_params.astype(jnp.float32)
    gear_params = gear_params.astype(jnp.float32)

    B, input_dim = physics_params.shape
    gear_length = gear_params.shape[1]
    hidden = lay["hidden"]
    rows, cols = lay["rows"], lay["cols"]

    # Batch tiling: big blocks (amortise per-step overhead), >= 2 grid steps at large B
    # so the "parallel" axis shards across v7x's two TensorCores.  If a single block
    # covers the whole batch, use the exact batch size (no padding at all).
    block_b = min(block_b_max, max(8, _round_up(_cdiv(B, 2), 8)))
    if block_b >= B:
        block_b = B
    grid_b = _cdiv(B, block_b)

    kernel = functools.partial(_physics_encoder_kernel, lay=lay)

    flops = 2 * B * (gear_length * latent_dim + input_dim * hidden
                     + latent_dim * hidden + hidden * latent_dim)
    bytes_accessed = int(B * (input_dim + gear_length + latent_dim) * 4
                         + slab.size * slab.dtype.itemsize + bias.size * 4)

    out = pl.pallas_call(
        kernel,
        out_shape=jax.ShapeDtypeStruct((B, latent_dim), jnp.float32),
        grid_spec=pltpu.PrefetchScalarGridSpec(
            num_scalar_prefetch=0,
            grid=(grid_b,),
            in_specs=[
                pl.BlockSpec((block_b, input_dim), lambda i: (i, 0)),
                pl.BlockSpec((block_b, gear_length), lambda i: (i, 0)),
                pl.BlockSpec((rows, cols), lambda i: (0, 0)),   # weights stay resident
                pl.BlockSpec((3, cols), lambda i: (0, 0)),      # f32 biases stay resident
            ],
            out_specs=pl.BlockSpec((block_b, latent_dim), lambda i: (i, 0)),
        ),
        compiler_params=pltpu.CompilerParams(
            dimension_semantics=("parallel",),
            vmem_limit_bytes=32 << 20,
        ),
        cost_estimate=pl.CostEstimate(flops=flops, transcendentals=0,
                                      bytes_accessed=bytes_accessed),
    )(physics_params, gear_params, slab, bias)

    return out


def init_params(key, input_dim, latent_dim, gear_length, gear_dim, hidden=64):
    """Deterministic synthetic parameters; weights stored as (in, out), biases 1-D."""
    ks = jax.random.split(key, 8)
    s = 0.1

    def w(k, i, o):
        return (s * jax.random.normal(k, (i, o))).astype(jnp.float32)

    def b(k, o):
        return (s * jax.random.normal(k, (o,))).astype(jnp.float32)

    return {
        "wg1": w(ks[0], gear_length, latent_dim), "bg1": b(ks[1], latent_dim),
        "wg2": w(ks[2], latent_dim, gear_dim),    "bg2": b(ks[3], gear_dim),
        "we1": w(ks[4], input_dim + gear_dim, hidden), "be1": b(ks[5], hidden),
        "we2": w(ks[6], hidden, latent_dim),      "be2": b(ks[7], latent_dim),
    }


def reference(physics_params, gear_params, p):
    """Pure-JAX reference of the torch forward (dropout in eval mode), unfused."""
    h = jnp.maximum(gear_params @ p["wg1"] + p["bg1"], 0.0)
    gear_latent = h @ p["wg2"] + p["bg2"]
    cat = jnp.concatenate([physics_params, gear_latent], axis=1)
    z = jnp.maximum(cat @ p["we1"] + p["be1"], 0.0)
    return z @ p["we2"] + p["be2"]


if __name__ == "__main__":
    # Small shapes consistent with the module's constructor.
    batch = 2
    input_dim = 8       # physics_params feature dim
    latent_dim = 32     # output dim of PhysicsEncoder
    gear_length = 6     # gear_params feature dim
    gear_dim = 4        # gear latent dim

    key = jax.random.PRNGKey(0)
    k_phys, k_gear, k_params = jax.random.split(key, 3)

    physics_params = jax.random.normal(k_phys, (batch, input_dim), jnp.float32)
    gear_params = jax.random.normal(k_gear, (batch, gear_length), jnp.float32)
    raw = init_params(k_params, input_dim, latent_dim, gear_length, gear_dim)
    ref = reference(physics_params, gear_params, raw)

    # f32 weight slab: tight check against the unfused reference.
    slab32, bias32, lay = pack_params(raw, input_dim, latent_dim, gear_length,
                                      gear_dim, weight_dtype=jnp.float32)
    out32 = jax.block_until_ready(
        physics_encoder(physics_params, gear_params, slab32, bias32, lay, latent_dim))
    assert out32.shape == (batch, latent_dim), out32.shape
    assert jnp.allclose(out32, ref, atol=1e-5, rtol=1e-5), (
        float(jnp.max(jnp.abs(out32 - ref))))

    # bf16 weight slab (halved weight DMA, native MXU path); biases & accum stay f32.
    slab16, bias16, lay16 = pack_params(raw, input_dim, latent_dim, gear_length,
                                        gear_dim, weight_dtype=jnp.bfloat16)
    out16 = jax.block_until_ready(
        physics_encoder(physics_params, gear_params, slab16, bias16, lay16, latent_dim))
    assert out16.shape == (batch, latent_dim), out16.shape
    assert jnp.allclose(out16, ref, atol=5e-2, rtol=5e-2), (
        float(jnp.max(jnp.abs(out16 - ref))))

    # 1-D input path (torch's unsqueeze(0) behaviour).
    out1 = jax.block_until_ready(
        physics_encoder(physics_params[0], gear_params[0], slab32, bias32, lay,
                        latent_dim))
    assert out1.shape == (1, latent_dim), out1.shape
    assert jnp.allclose(out1, ref[0:1], atol=1e-5, rtol=1e-5)

    # Multi-block grid with a ragged batch tail (block 16, tail of 4 rows).
    batch2 = 20
    k_p2, k_g2 = jax.random.split(jax.random.PRNGKey(1), 2)
    phys2 = jax.random.normal(k_p2, (batch2, input_dim), jnp.float32)
    gear2 = jax.random.normal(k_g2, (batch2, gear_length), jnp.float32)
    ref2 = reference(phys2, gear2, raw)
    out2 = jax.block_until_ready(
        physics_encoder(phys2, gear2, slab32, bias32, lay, latent_dim))
    assert out2.shape == (batch2, latent_dim), out2.shape
    assert jnp.allclose(out2, ref2, atol=1e-5, rtol=1e-5), (
        float(jnp.max(jnp.abs(out2 - ref2))))

    print("KERNEL_OK")
</pallas_src>

<mosaic_0001>
module attributes {stable_mosaic.version = 11 : i64} {
  func.func @_physics_encoder_kernel(%arg0: i32, %arg1: memref<2x8xf32, #tpu.memory_space<vmem>>, %arg2: memref<2x6xf32, #tpu.memory_space<vmem>>, %arg3: memref<128x64xf32, #tpu.memory_space<vmem>>, %arg4: memref<3x64xf32, #tpu.memory_space<vmem>>, %arg5: memref<2x32xf32, #tpu.memory_space<vmem>>) attributes {dimension_semantics = [#tpu.dimension_semantics<parallel>], iteration_bounds = array<i64: 1>, scalar_prefetch = 0 : i64, scratch_operands = 0 : i64, tpu.core_type = #tpu.core_type<tc>, window_params = [{transform_indices = @transform_0, window_bounds = array<i64: 2, 8>}, {transform_indices = @transform_1, window_bounds = array<i64: 2, 6>}, {pipeline_mode = #tpu.pipeline_mode<synchronous>, transform_indices = @transform_2, window_bounds = array<i64: 128, 64>}, {pipeline_mode = #tpu.pipeline_mode<synchronous>, transform_indices = @transform_3, window_bounds = array<i64: 3, 64>}, {transform_indices = @transform_4, window_bounds = array<i64: 2, 32>}]} {
    %c0 = arith.constant 0 : index
    %c0_0 = arith.constant 0 : index
    %0 = vector.load %arg3[%c0, %c0_0] : memref<128x64xf32, #tpu.memory_space<vmem>>, vector<6x32xf32>
    %c16 = arith.constant 16 : index
    %c0_1 = arith.constant 0 : index
    %1 = vector.load %arg3[%c16, %c0_1] : memref<128x64xf32, #tpu.memory_space<vmem>>, vector<8x64xf32>
    %c32 = arith.constant 32 : index
    %c0_2 = arith.constant 0 : index
    %2 = vector.load %arg3[%c32, %c0_2] : memref<128x64xf32, #tpu.memory_space<vmem>>, vector<32x64xf32>
    %c64 = arith.constant 64 : index
    %c0_3 = arith.constant 0 : index
    %3 = vector.load %arg3[%c64, %c0_3] : memref<128x64xf32, #tpu.memory_space<vmem>>, vector<64x32xf32>
    %c0_4 = arith.constant 0 : index
    %c0_5 = arith.constant 0 : index
    %4 = vector.load %arg4[%c0_4, %c0_5] : memref<3x64xf32, #tpu.memory_space<vmem>>, vector<1x32xf32>
    %c1 = arith.constant 1 : index
    %c0_6 = arith.constant 0 : index
    %5 = vector.load %arg4[%c1, %c0_6] : memref<3x64xf32, #tpu.memory_space<vmem>>, vector<1x64xf32>
    %c2 = arith.constant 2 : index
    %c0_7 = arith.constant 0 : index
    %6 = vector.load %arg4[%c2, %c0_7] : memref<3x64xf32, #tpu.memory_space<vmem>>, vector<1x32xf32>
    %c0_8 = arith.constant 0 : index
    %c0_9 = arith.constant 0 : index
    %7 = vector.load %arg2[%c0_8, %c0_9] : memref<2x6xf32, #tpu.memory_space<vmem>>, vector<2x6xf32>
    %cst = arith.constant dense<0.000000e+00> : vector<2x32xf32>
    %8 = tpu.matmul %7, %0, %cst {dimension_numbers = #tpu.dot_dimension_numbers<[1], [0], [0], [1], [0, 0, 1, 1], [], []>} : vector<2x6xf32>, vector<6x32xf32>, vector<2x32xf32> -> vector<2x32xf32>
    %9 = vector.broadcast %4 : vector<1x32xf32> to vector<2x32xf32>
    %10 = arith.addf %8, %9 : vector<2x32xf32>
    %cst_10 = arith.constant 0.000000e+00 : f32
    %11 = vector.broadcast %cst_10 : f32 to vector<2x32xf32>
    %12 = arith.maximumf %10, %11 : vector<2x32xf32>
    %c0_11 = arith.constant 0 : index
    %c0_12 = arith.constant 0 : index
    %13 = vector.load %arg1[%c0_11, %c0_12] : memref<2x8xf32, #tpu.memory_space<vmem>>, vector<2x8xf32>
    %cst_13 = arith.constant dense<0.000000e+00> : vector<2x64xf32>
    %14 = tpu.matmul %13, %1, %cst_13 {dimension_numbers = #tpu.dot_dimension_numbers<[1], [0], [0], [1], [0, 0, 1, 1], [], []>} : vector<2x8xf32>, vector<8x64xf32>, vector<2x64xf32> -> vector<2x64xf32>
    %cst_14 = arith.constant dense<0.000000e+00> : vector<2x64xf32>
    %15 = tpu.matmul %12, %2, %cst_14 {dimension_numbers = #tpu.dot_dimension_numbers<[1], [0], [0], [1], [0, 0, 1, 1], [], []>} : vector<2x32xf32>, vector<32x64xf32>, vector<2x64xf32> -> vector<2x64xf32>
    %16 = arith.addf %14, %15 : vector<2x64xf32>
    %17 = vector.broadcast %5 : vector<1x64xf32> to vector<2x64xf32>
    %18 = arith.addf %16, %17 : vector<2x64xf32>
    %cst_15 = arith.constant 0.000000e+00 : f32
    %19 = vector.broadcast %cst_15 : f32 to vector<2x64xf32>
    %20 = arith.maximumf %18, %19 : vector<2x64xf32>
    %cst_16 = arith.constant dense<0.000000e+00> : vector<2x32xf32>
    %21 = tpu.matmul %20, %3, %cst_16 {dimension_numbers = #tpu.dot_dimension_numbers<[1], [0], [0], [1], [0, 0, 1, 1], [], []>} : vector<2x64xf32>, vector<64x32xf32>, vector<2x32xf32> -> vector<2x32xf32>
    %22 = vector.broadcast %6 : vector<1x32xf32> to vector<2x32xf32>
    %23 = arith.addf %21, %22 : vector<2x32xf32>
    %c0_17 = arith.constant 0 : index
    %c0_18 = arith.constant 0 : index
    %24 = vector.load %arg5[%c0_17, %c0_18] : memref<2x32xf32, #tpu.memory_space<vmem>>, vector<2x32xf32>
    tpu.vector_store %arg5[%c0_17, %c0_18], %23 {strides = array<i32>} : memref<2x32xf32, #tpu.memory_space<vmem>>, vector<2x32xf32>,
    return
  }
  func.func @transform_0(%arg0: i32) -> (i32, i32) {
    %c0_i32 = arith.constant 0 : i32
    %c0_i32_0 = arith.constant 0 : i32
    return %arg0, %c0_i32 : i32, i32
  }
  func.func @transform_1(%arg0: i32) -> (i32, i32) {
    %c0_i32 = arith.constant 0 : i32
    %c0_i32_0 = arith.constant 0 : i32
    return %arg0, %c0_i32 : i32, i32
  }
  func.func @transform_2(%arg0: i32) -> (i32, i32) {
    %c0_i32 = arith.constant 0 : i32
    %c0_i32_0 = arith.constant 0 : i32
    %c0_i32_1 = arith.constant 0 : i32
    return %c0_i32, %c0_i32_0 : i32, i32
  }
  func.func @transform_3(%arg0: i32) -> (i32, i32) {
    %c0_i32 = arith.constant 0 : i32
    %c0_i32_0 = arith.constant 0 : i32
    %c0_i32_1 = arith.constant 0 : i32
    return %c0_i32, %c0_i32_0 : i32, i32
  }
  func.func @transform_4(%arg0: i32) -> (i32, i32) {
    %c0_i32 = arith.constant 0 : i32
    %c0_i32_0 = arith.constant 0 : i32
    return %arg0, %c0_i32 : i32, i32
  }
}

</mosaic_0001>

<bundles_post_ra>
// kernel: tpu_custom_call.1
= control target key start
LH: loop header
LB: loop body
LE: loop exit
PB: predicated region body
PF: predicated region fallthrough
CT: control target
= control target key end

     0   :  { %vm44_vm0 = vcmask 1045504   ;;  %vm40_vm1 = vcmask 48128   ;;  %v459_v1 = vmov 0.0   ;;  %vm460_vm2 = vmmov 0   ;;  %s551_s0 = inlined_call_operand.vmem [shape: f32[2,8], index: 0, kind: input, shape index: {}]   ;;  %s552_s1 = inlined_call_operand.vmem [shape: f32[2,6], index: 1, kind: input, shape index: {}]   ;;  %s553_s2 = inlined_call_operand.vmem [shape: f32[128,64], index: 2, kind: input, shape index: {}]   ;;  %s554_s3 = inlined_call_operand.vmem [shape: f32[3,64], index: 3, kind: input, shape index: {}]   ;;  %s555_s4 = inlined_call_operand.hbm [shape: f32[2,32], index: 4, kind: output, shape index: {}]  }
   0x1   :  { %v18_v0 = vld [vmem:[%s553_s2] sm:$0x3f]  ;;  %394 = vmatprep.subr.mxu1 %v459_v1  ;;  %396 = vmatprep.mubr.msk.f32.mxu1 %vm460_vm2, %v459_v1  ;;  %v23_v3 = vld [vmem:[%s553_s2 + $0x38] sm:$0xff] }
   0x2   :  { %v35_v2 = vld [vmem:[%s552_s1] sm:$0x3]  ;;  %395 = vmatpush3.msk.msra.mxu1 %vm44_vm0, %v18_v0  ;;  %415 = vmatprep.subr.mxu0 %v459_v1 }
   0x3   :  { %9 = vsyncpa [#allocation3], 0  ;;  %397 = vmatmul.mubr.msk.f32.vlgmr.msra.gmra.mxu1 %vm40_vm1, %v35_v2  ;;  %399 = vmatprep.subr.mxu1 %v459_v1  ;;  %v22_v4 = vld [vmem:[%s553_s2 + $0x30] sm:$0xff]  ;;  %v21_v5 = vld [vmem:[%s553_s2 + $0x28] sm:$0xff]  ;;  %vm120_vm3 = vcmask 261120   ;;  %vm194_vm4 = vcmask 64512  }
   0x4   :  { %400 = vmatpush3.msra.mxu1 %v23_v3  ;;  %407 = vmatprep.mubr.msk.f32.mxu1 %vm460_vm2, %v459_v1  ;;  %v20_v6 = vld [vmem:[%s553_s2 + $0x20] sm:$0xff]  ;;  %v31_v7 = vld [vmem:[%s553_s2 + $0x78] sm:$0xff]  ;;  %v30_v8 = vld [vmem:[%s553_s2 + $0x70] sm:$0xff]  ;;  %vm278_vm5 = vcmask 523264   ;;  %s461_s24 = smov [#allocation2]   ;;  %vm352_vm6 = vcmask 254976  }
   0x5   :  { %401 = vmatprep.subr.mxu1 %v459_v1  ;;  %431 = vmatprep.mubr.msk.f32.mxu0 %vm460_vm2, %v459_v1  ;;  %v368_v9 = vld [vmem:[%s554_s3] ss:$0 sm:$0xff]  ;;  %v19_v14 = vld [vmem:[%s553_s2 + $0x10] sm:$0xff]  ;;  %v29_v16 = vld [vmem:[%s553_s2 + $0x68] sm:$0xff] }
   0x6   :  { %402 = vmatpush3.msra.mxu1 %v22_v4  ;;  %416 = vmatpush3.msra.mxu0 %v31_v7  ;;  %v119_v15 = vld [vmem:[%s551_s0] sm:$0x3]  ;;  %v27_v18 = vld [vmem:[%s553_s2 + $0x58] sm:$0xff]  ;;  %v26_v19 = vld [vmem:[%s553_s2 + $0x50] sm:$0xff] }
   0x7   :  { %403 = vmatprep.subr.mxu1 %v459_v1  ;;  %417 = vmatprep.subr.mxu0 %v459_v1  ;;  %v28_v17 = vld [vmem:[%s553_s2 + $0x60] sm:$0xff]  ;;  %v25_v20 = vld [vmem:[%s553_s2 + $0x48] sm:$0xff] }
   0x8   :  { %404 = vmatpush3.msra.mxu1 %v21_v5  ;;  %418 = vmatpush3.msra.mxu0 %v30_v8  ;;  %v24_v21 = vld [vmem:[%s553_s2 + $0x40] sm:$0xff]  ;;  %s360_s2 = sshll.u32 %s461_s24, 4  ;;  %s361_s2 = int_to_ptr.vmem [resolvable:$true] %s360_s2 }
   0x9   :  { %405 = vmatprep.subr.mxu1 %v459_v1  ;;  %419 = vmatprep.subr.mxu0 %v459_v1  ;;  %v373_v24 = vld [vmem:[%s554_s3 + $0x1] ss:$0 sm:$0xff]  ;;  %v374_v30 = vld [vmem:[%s554_s3 + $0x2] ss:$0 sm:$0xff]  ;;  %s437_s25 = scalar_lea.vmem %s361_s2, 32  ;;  %p442_p1 = scmp.lt.s32.totalorder %s361_s2, %s361_s2 }
   0xa   :  { %406 = vmatpush3.msra.mxu1 %v20_v6  ;;  %420 = vmatpush3.msra.mxu0 %v29_v16  ;;  %p438_p0 = scmp.ne.s32.totalorder %s361_s2, %s437_s25  ;;  %p443_p2 = scmp.lt.s32.totalorder %s437_s25, %s437_s25 }
   0xb   :  { %410 = vmatprep.subr.mxu1 %v459_v1  ;;  %421 = vmatprep.subr.mxu0 %v459_v1 }
   0xc   :  { %422 = vmatpush3.msra.mxu0 %v28_v17  ;;  %p444_p3 = por %p443_p2, %p442_p1 }
   0xd   :  { %423 = vmatprep.subr.mxu0 %v459_v1 }
   0xe   :  { %424 = vmatpush3.msra.mxu0 %v27_v18  ;;  %p445_p4 = pnand %p444_p3, %p438_p0 }
   0xf   :  { %425 = vmatprep.subr.mxu0 %v459_v1 }
  0x10   :  { %426 = vmatpush3.msra.mxu0 %v26_v19 }
  0x11   :  { %427 = vmatprep.subr.mxu0 %v459_v1 }
  0x12   :  { %428 = vmatpush3.msra.mxu0 %v25_v20 }
  0x13   :  { %429 = vmatprep.subr.mxu0 %v459_v1 }
  0x14   :  { %430 = vmatpush3.msra.mxu0 %v24_v21 }
  0xc3   :  { %v114_v10 = vpop.f32.mrf.mxu1 }
  0xc4   :  { %v115_v11 = vadd.f32 %v368_v9, %v114_v10 }
  0xc5   :  { %v398_v12 = vpop.f32.mrf.mxu1 }
  0xc6   :  { %v118_v13 = vmax.f32 %v115_v11, 0.0 }
  0xc8   :  { %408 = vmatmul.mubr.msk.f32.vlgmr.msra.gmra.mxu1 %vm120_vm3, %v118_v13 }
  0xc9   :  { %411 = vmatpush3.msra.mxu1 %v19_v14  ;;  %412 = vmatprep.mubr.msk.f32.mxu1 %vm460_vm2, %v459_v1 }
  0xcc   :  { %413 = vmatmul.mubr.msk.f32.vlgmr.msra.gmra.mxu1 %vm194_vm4, %v119_v15 }
 0x188   :  { %v190_v22 = vpop.f32.mrf.mxu1 }
 0x18a   :  { %v409_v23 = vpop.f32.mrf.mxu1 }
 0x18c   :  { %v264_v25 = vpop.f32.mrf.mxu1 }
 0x18d   :  { %v265_v26 = vadd.f32 %v264_v25, %v190_v22 }
 0x18e   :  { %v414_v27 = vpop.f32.mrf.mxu1 }
 0x18f   :  { %v272_v28 = vadd.f32 %v373_v24, %v265_v26 }
 0x191   :  { %v273_v29 = vmax.f32 %v272_v28, 0.0 }
 0x193   :  { %432 = vmatmul.mubr.msk.f32.vlgmr.msra.gmra.mxu0 %vm278_vm5, %v273_v29 }
 0x253   :  { %v348_v31 = vpop.f32.mrf.mxu0 }
 0x254   :  { %v349_v32 = vadd.f32 %v374_v30, %v348_v31 }
 0x255   :  { %v433_v33 = vpop.f32.mrf.mxu0 }
 0x256   :  { %353 = vst.msk [vmem:[#allocation2] sm:$0x3] %vm352_vm6, %v349_v32 }
 0x257   :  { %448 = shalt.err (!%p445_p4)
}
 0x258   :  { %363 = dma.vmem_to_hbm [thread:$0]  %s361_s2, 32, %s555_s4, [#allocation3]  }
 0x259   :  { %457 = dma.done.wait [#allocation3], 32  }
 0x25a   :  { %458 = vsyncadd [#allocation3], 4294967264 }
 0x25b   :  { %367 = vsyncpa [#allocation3], 1 }

</bundles_post_ra>
